<compile_context>
chip_gen: v7x
topology: tpu7x:2x2x1
jax: 0.10.0
libtpu: 0.0.40
codegen_flags: <defaults>
</compile_context>

<pallas_src>
import functools

import jax
import jax.numpy as jnp
from jax.experimental import pallas as pl
from jax.experimental.pallas import tpu as pltpu

LANE = 128
BLOCK_M = 512  # batch tile for the gridded (large-batch) path


def _actor_critic_kernel(x_ref, w1_ref, b1_ref, w2_ref, b2_ref,
                         wh_ref, bh_ref, out_ref):
    # fc1 + relu: bf16 x bf16 matmul (K = input_dims), f32 accumulation.
    x = x_ref[...].astype(w1_ref.dtype)
    h1 = jnp.dot(x, w1_ref[...], preferred_element_type=jnp.float32)
    h1 = jnp.maximum(h1 + b1_ref[...], 0.0).astype(w2_ref.dtype)
    # fc2 + relu: bf16 weights, f32 accumulation on the MXU.
    h2 = jnp.dot(h1, w2_ref[...], preferred_element_type=jnp.float32)
    h2 = jnp.maximum(h2 + b2_ref[...], 0.0).astype(wh_ref.dtype)
    # fused policy + value head: columns [0, n_actions) = pi, column n_actions = v.
    out_ref[...] = jnp.dot(h2, wh_ref[...],
                           preferred_element_type=jnp.float32) + bh_ref[...]


def prepare_params(params, n_actions):
    """One-time weight prep: fuse pi|v heads, reshape biases, cast weights to bf16."""
    w1, b1, w2, b2, wpi, bpi, wv, bv = params
    d_in, fc1_dims = w1.shape
    fc2_dims = w2.shape[1]
    head_w = LANE  # fused head padded to one lane-dense 128-wide tile

    wh = jnp.zeros((fc2_dims, head_w), jnp.float32)
    wh = wh.at[:, :n_actions].set(wpi)
    wh = wh.at[:, n_actions:n_actions + 1].set(wv)
    bh = jnp.zeros((1, head_w), jnp.float32)
    bh = bh.at[0, :n_actions].set(bpi)
    bh = bh.at[0, n_actions].set(bv[0])

    return (
        w1.astype(jnp.bfloat16),                       # [d_in, 256] bf16
        b1.reshape(1, fc1_dims).astype(jnp.float32),
        w2.astype(jnp.bfloat16),                       # [256, 256]  bf16
        b2.reshape(1, fc2_dims).astype(jnp.float32),
        wh.astype(jnp.bfloat16),                       # [256, 128]  fused pi|v head, bf16
        bh,                                            # [1, 128]    f32
    )


@functools.partial(jax.jit, static_argnames=("n_actions", "block_m"))
def actor_critic_forward(state, prepared, n_actions, block_m=BLOCK_M):
    """state: [B, input_dims] f32; prepared = prepare_params(...).
    Returns (pi [B, n_actions], v [B, 1])."""
    w1, b1, w2, b2, wh, bh = prepared
    B, d_in = state.shape
    fc1_dims = w1.shape[1]
    fc2_dims = w2.shape[1]
    head_w = wh.shape[1]

    flops = 2 * B * (d_in * fc1_dims + fc1_dims * fc2_dims + fc2_dims * head_w)
    bytes_accessed = (B * d_in * 4 + B * head_w * 4          # input + output (f32)
                      + (w1.size + w2.size + wh.size) * 2    # bf16 weights
                      + (b1.size + b2.size + bh.size) * 4)   # f32 biases
    cost = pl.CostEstimate(flops=flops, transcendentals=0,
                           bytes_accessed=bytes_accessed)

    args = (state, w1, b1, w2, b2, wh, bh)
    out_shape = jax.ShapeDtypeStruct((B, head_w), jnp.float32)

    if B <= block_m:
        # Small / rollout batch: single shot, full-array blocks (exempt from the
        # (8,128) divisibility rule) -> no per-call padding, one DMA per operand.
        full = lambda shape: pl.BlockSpec(shape, lambda: (0,) * len(shape))
        out = pl.pallas_call(
            _actor_critic_kernel,
            out_shape=out_shape,
            grid=(),
            in_specs=[
                full((B, d_in)),
                full((d_in, fc1_dims)), full((1, fc1_dims)),
                full((fc1_dims, fc2_dims)), full((1, fc2_dims)),
                full((fc2_dims, head_w)), full((1, head_w)),
            ],
            out_specs=full((B, head_w)),
            cost_estimate=cost,
        )(*args)
    else:
        # Large batch: tile the batch dim; weights use constant index_maps so
        # they stay VMEM-resident, and the batch axis is megacore-parallel.
        const = lambda shape: pl.BlockSpec(shape, lambda i: (0,) * len(shape))
        out = pl.pallas_call(
            _actor_critic_kernel,
            out_shape=out_shape,
            grid=(pl.cdiv(B, block_m),),
            in_specs=[
                pl.BlockSpec((block_m, d_in), lambda i: (i, 0)),
                const((d_in, fc1_dims)), const((1, fc1_dims)),
                const((fc1_dims, fc2_dims)), const((1, fc2_dims)),
                const((fc2_dims, head_w)), const((1, head_w)),
            ],
            out_specs=pl.BlockSpec((block_m, head_w), lambda i: (i, 0)),
            compiler_params=pltpu.CompilerParams(
                dimension_semantics=("parallel",)),
            cost_estimate=cost,
        )(*args)

    # Single lane-dense output; slice pi / v out of it.
    return out[:, :n_actions], out[:, n_actions:n_actions + 1]


def init_params(key, input_dims, n_actions, fc1_dims=256, fc2_dims=256):
    """Deterministic init mimicking torch.nn.Linear (uniform +/- 1/sqrt(fan_in)).
    Weights are stored as [in, out]."""
    ks = jax.random.split(key, 8)

    def linear(kw, kb, fan_in, fan_out):
        bound = 1.0 / jnp.sqrt(jnp.float32(fan_in))
        w = jax.random.uniform(kw, (fan_in, fan_out), jnp.float32, -bound, bound)
        b = jax.random.uniform(kb, (fan_out,), jnp.float32, -bound, bound)
        return w, b

    w1, b1 = linear(ks[0], ks[1], input_dims, fc1_dims)
    w2, b2 = linear(ks[2], ks[3], fc1_dims, fc2_dims)
    wpi, bpi = linear(ks[4], ks[5], fc2_dims, n_actions)
    wv, bv = linear(ks[6], ks[7], fc2_dims, 1)
    return (w1, b1, w2, b2, wpi, bpi, wv, bv)


def reference_forward(state, params):
    w1, b1, w2, b2, wpi, bpi, wv, bv = params
    h1 = jnp.maximum(state @ w1 + b1, 0.0)
    h2 = jnp.maximum(h1 @ w2 + b2, 0.0)
    return h2 @ wpi + bpi, h2 @ wv + bv


if __name__ == "__main__":
    # LunarLander-v2: observation dim 8, 4 discrete actions.
    B, INPUT_DIMS, N_ACTIONS = 2, 8, 4
    TOL = 3e-2  # bf16 weights with f32 accumulation vs f32 reference

    key = jax.random.PRNGKey(0)
    k_param, k_state, k_big = jax.random.split(key, 3)
    params = init_params(k_param, INPUT_DIMS, N_ACTIONS)

    # One-time weight prep (head fusion / bf16 cast) off the per-call path.
    prepared = jax.block_until_ready(prepare_params(params, N_ACTIONS))

    # --- small (rollout-sized) batch: grid=() path, no padding ---
    state = jax.random.normal(k_state, (B, INPUT_DIMS), jnp.float32)
    pi, v = jax.block_until_ready(actor_critic_forward(state, prepared, N_ACTIONS))
    pi_ref, v_ref = reference_forward(state, params)
    assert pi.shape == (B, N_ACTIONS) and v.shape == (B, 1)
    assert jnp.allclose(pi, pi_ref, atol=TOL, rtol=TOL), float(jnp.max(jnp.abs(pi - pi_ref)))
    assert jnp.allclose(v, v_ref, atol=TOL, rtol=TOL), float(jnp.max(jnp.abs(v - v_ref)))

    # --- large batch: gridded path (VMEM-resident weights, parallel batch axis) ---
    BIG = 1024
    state_big = jax.random.normal(k_big, (BIG, INPUT_DIMS), jnp.float32)
    pi_b, v_b = jax.block_until_ready(actor_critic_forward(state_big, prepared, N_ACTIONS))
    pi_bref, v_bref = reference_forward(state_big, params)
    assert pi_b.shape == (BIG, N_ACTIONS) and v_b.shape == (BIG, 1)
    assert jnp.allclose(pi_b, pi_bref, atol=TOL, rtol=TOL), float(jnp.max(jnp.abs(pi_b - pi_bref)))
    assert jnp.allclose(v_b, v_bref, atol=TOL, rtol=TOL), float(jnp.max(jnp.abs(v_b - v_bref)))

    print("KERNEL_OK")
</pallas_src>

<mosaic_0001>
module attributes {stable_mosaic.version = 11 : i64} {
  func.func @_actor_critic_kernel(%arg0: memref<2x8xf32, #tpu.memory_space<vmem>>, %arg1: memref<8x256xbf16, #tpu.memory_space<vmem>>, %arg2: memref<1x256xf32, #tpu.memory_space<vmem>>, %arg3: memref<256x256xbf16, #tpu.memory_space<vmem>>, %arg4: memref<1x256xf32, #tpu.memory_space<vmem>>, %arg5: memref<256x128xbf16, #tpu.memory_space<vmem>>, %arg6: memref<1x128xf32, #tpu.memory_space<vmem>>, %arg7: memref<2x128xf32, #tpu.memory_space<vmem>>) attributes {dimension_semantics = [], scalar_prefetch = 0 : i64, scratch_operands = 0 : i64, tpu.core_type = #tpu.core_type<tc>} {
    %c0 = arith.constant 0 : index
    %c0_0 = arith.constant 0 : index
    %0 = vector.load %arg0[%c0, %c0_0] : memref<2x8xf32, #tpu.memory_space<vmem>>, vector<2x8xf32>
    %1 = arith.truncf %0 : vector<2x8xf32> to vector<2x8xbf16>
    %c0_1 = arith.constant 0 : index
    %c0_2 = arith.constant 0 : index
    %2 = vector.load %arg1[%c0_1, %c0_2] : memref<8x256xbf16, #tpu.memory_space<vmem>>, vector<8x256xbf16>
    %cst = arith.constant dense<0.000000e+00> : vector<2x256xf32>
    %3 = tpu.matmul %1, %2, %cst {dimension_numbers = #tpu.dot_dimension_numbers<[1], [0], [0], [1], [0, 0, 1, 1], [], []>} : vector<2x8xbf16>, vector<8x256xbf16>, vector<2x256xf32> -> vector<2x256xf32>
    %c0_3 = arith.constant 0 : index
    %c0_4 = arith.constant 0 : index
    %4 = vector.load %arg2[%c0_3, %c0_4] : memref<1x256xf32, #tpu.memory_space<vmem>>, vector<1x256xf32>
    %5 = vector.broadcast %4 : vector<1x256xf32> to vector<2x256xf32>
    %6 = arith.addf %3, %5 : vector<2x256xf32>
    %cst_5 = arith.constant 0.000000e+00 : f32
    %7 = vector.broadcast %cst_5 : f32 to vector<2x256xf32>
    %8 = arith.maximumf %6, %7 : vector<2x256xf32>
    %9 = arith.truncf %8 : vector<2x256xf32> to vector<2x256xbf16>
    %c0_6 = arith.constant 0 : index
    %c0_7 = arith.constant 0 : index
    %10 = vector.load %arg3[%c0_6, %c0_7] : memref<256x256xbf16, #tpu.memory_space<vmem>>, vector<256x256xbf16>
    %cst_8 = arith.constant dense<0.000000e+00> : vector<2x256xf32>
    %11 = tpu.matmul %9, %10, %cst_8 {dimension_numbers = #tpu.dot_dimension_numbers<[1], [0], [0], [1], [0, 0, 1, 1], [], []>} : vector<2x256xbf16>, vector<256x256xbf16>, vector<2x256xf32> -> vector<2x256xf32>
    %c0_9 = arith.constant 0 : index
    %c0_10 = arith.constant 0 : index
    %12 = vector.load %arg4[%c0_9, %c0_10] : memref<1x256xf32, #tpu.memory_space<vmem>>, vector<1x256xf32>
    %13 = vector.broadcast %12 : vector<1x256xf32> to vector<2x256xf32>
    %14 = arith.addf %11, %13 : vector<2x256xf32>
    %cst_11 = arith.constant 0.000000e+00 : f32
    %15 = vector.broadcast %cst_11 : f32 to vector<2x256xf32>
    %16 = arith.maximumf %14, %15 : vector<2x256xf32>
    %17 = arith.truncf %16 : vector<2x256xf32> to vector<2x256xbf16>
    %c0_12 = arith.constant 0 : index
    %c0_13 = arith.constant 0 : index
    %18 = vector.load %arg5[%c0_12, %c0_13] : memref<256x128xbf16, #tpu.memory_space<vmem>>, vector<256x128xbf16>
    %cst_14 = arith.constant dense<0.000000e+00> : vector<2x128xf32>
    %19 = tpu.matmul %17, %18, %cst_14 {dimension_numbers = #tpu.dot_dimension_numbers<[1], [0], [0], [1], [0, 0, 1, 1], [], []>} : vector<2x256xbf16>, vector<256x128xbf16>, vector<2x128xf32> -> vector<2x128xf32>
    %c0_15 = arith.constant 0 : index
    %c0_16 = arith.constant 0 : index
    %20 = vector.load %arg6[%c0_15, %c0_16] : memref<1x128xf32, #tpu.memory_space<vmem>>, vector<1x128xf32>
    %21 = vector.broadcast %20 : vector<1x128xf32> to vector<2x128xf32>
    %22 = arith.addf %19, %21 : vector<2x128xf32>
    %c0_17 = arith.constant 0 : index
    %c0_18 = arith.constant 0 : index
    %23 = vector.load %arg7[%c0_17, %c0_18] : memref<2x128xf32, #tpu.memory_space<vmem>>, vector<2x128xf32>
    tpu.vector_store %arg7[%c0_17, %c0_18], %22 {strides = array<i32>} : memref<2x128xf32, #tpu.memory_space<vmem>>, vector<2x128xf32>,
    return
  }
}

</mosaic_0001>

<bundles_post_ra>
// kernel: actor_critic_forward.1
= control target key start
LH: loop header
LB: loop body
LE: loop exit
PB: predicated region body
PF: predicated region fallthrough
CT: control target
= control target key end

     0   :  { %12 = vsyncpa [#allocation3], 0  ;;  %s939_s0 = inlined_call_operand.hbm [shape: f32[2,8], index: 0, kind: input, shape index: {}]   ;;  %s940_s1 = inlined_call_operand.hbm [shape: bf16[8,256], index: 1, kind: input, shape index: {}]   ;;  %s941_s2 = inlined_call_operand.vmem [shape: f32[1,256], index: 2, kind: input, shape index: {}]   ;;  %s942_s3 = inlined_call_operand.hbm [shape: bf16[256,256], index: 3, kind: input, shape index: {}]   ;;  %s943_s4 = inlined_call_operand.vmem [shape: f32[1,256], index: 4, kind: input, shape index: {}]   ;;  %s944_s5 = inlined_call_operand.hbm [shape: bf16[256,128], index: 5, kind: input, shape index: {}]   ;;  %s945_s6 = inlined_call_operand.vmem [shape: f32[1,128], index: 6, kind: input, shape index: {}]   ;;  %s946_s7 = inlined_call_operand.vmem [shape: f32[2,128], index: 7, kind: output, shape index: {}]  }
   0x1   :  { %13 = vsyncpa [#allocation5], 0 }
   0x2   :  { %14 = vsyncpa [#allocation8], 0  ;;  %s830_s24 = smov [#allocation4]   ;;  %s831_s26 = smov [#allocation2]  }
   0x3   :  { %s31_s25 = sshll.u32 %s830_s24, 4  ;;  %s21_s27 = sshll.u32 %s831_s26, 4  ;;  %s32_s25 = int_to_ptr.vmem [resolvable:$true] %s31_s25  ;;  %s22_s27 = int_to_ptr.vmem [resolvable:$true] %s21_s27 }
   0x4   :  { %s736_s30 = scalar_lea.hbm %s940_s1, 128 }
   0x5   :  { %p737_p0 = scmp.ne.s32.totalorder %s940_s1, %s736_s30  ;;  %p740_p1 = scmp.lt.u32.totalorder %s736_s30, %s940_s1 }
   0x7   :  { %p742_p2 = pnand %p740_p1, %p737_p0 }
   0x9   :  { %745 = shalt.err (!%p742_p2)
}
   0xa   :  { %s746_s12 = scalar_lea.vmem %s32_s25, 128  ;;  %p751_p4 = scmp.lt.s32.totalorder %s32_s25, %s32_s25 }
   0xb   :  { %p747_p3 = scmp.ne.s32.totalorder %s32_s25, %s746_s12  ;;  %p752_p5 = scmp.lt.s32.totalorder %s746_s12, %s746_s12 }
   0xd   :  { %p753_p6 = por %p752_p5, %p751_p4 }
   0xf   :  { %p754_p7 = pnand %p753_p6, %p747_p3 }
  0x11   :  { %757 = shalt.err (!%p754_p7)
}
  0x12   :  { %34 = dma.hbm_to_vmem [thread:$0]  %s940_s1, 128, %s32_s25, [#allocation5]  }
  0x13   :  { %s758_s17 = scalar_lea.hbm %s939_s0, 32 }
  0x14   :  { %p759_p8 = scmp.ne.s32.totalorder %s939_s0, %s758_s17  ;;  %p762_p9 = scmp.lt.u32.totalorder %s758_s17, %s939_s0 }
  0x16   :  { %p764_p10 = pnand %p762_p9, %p759_p8 }
  0x18   :  { %767 = shalt.err (!%p764_p10)
}
  0x19   :  { %s768_s22 = scalar_lea.vmem %s22_s27, 32  ;;  %p773_p12 = scmp.lt.s32.totalorder %s22_s27, %s22_s27 }
  0x1a   :  { %p769_p11 = scmp.ne.s32.totalorder %s22_s27, %s768_s22  ;;  %p774_p13 = scmp.lt.s32.totalorder %s768_s22, %s768_s22 }
  0x1c   :  { %p775_p0 = por %p774_p13, %p773_p12 }
  0x1e   :  { %p776_p1 = pnand %p775_p0, %p769_p11 }
  0x20   :  { %779 = shalt.err (!%p776_p1)
}
  0x21   :  { %24 = dma.hbm_to_vmem [thread:$0]  %s939_s0, 32, %s22_s27, [#allocation3]  }
  0x22   :  { %s832_s24 = smov [#allocation6]   ;;  %s780_s29 = scalar_lea.hbm %s942_s3, 4096 }
  0x23   :  { %s42_s25 = sshll.u32 %s832_s24, 4  ;;  %p781_p2 = scmp.ne.s32.totalorder %s942_s3, %s780_s29  ;;  %s43_s25 = int_to_ptr.vmem [resolvable:$true] %s42_s25 }
  0x24   :  { %p784_p3 = scmp.lt.u32.totalorder %s780_s29, %s942_s3 }
  0x26   :  { %p786_p4 = pnand %p784_p3, %p781_p2 }
  0x28   :  { %789 = shalt.err (!%p786_p4)
}
  0x29   :  { %s790_s11 = scalar_lea.vmem %s43_s25, 4096  ;;  %p795_p6 = scmp.lt.s32.totalorder %s43_s25, %s43_s25 }
  0x2a   :  { %p791_p5 = scmp.ne.s32.totalorder %s43_s25, %s790_s11  ;;  %p796_p7 = scmp.lt.s32.totalorder %s790_s11, %s790_s11 }
  0x2c   :  { %p797_p8 = por %p796_p7, %p795_p6 }
  0x2e   :  { %p798_p9 = pnand %p797_p8, %p791_p5 }
  0x30   :  { %801 = shalt.err (!%p798_p9)
}
  0x31   :  { %s833_s0 = smov 128   ;;  %s834_s27 = smov 8  }
  0x32   :  { %48 = dma.hbm_to_vmem [thread:$0]  %s942_s3, 4096, %s43_s25, [#allocation5], %s833_s0, %s833_s0, %s834_s27  }
  0x33   :  { %s835_s14 = smov [#allocation7]   ;;  %s802_s18 = scalar_lea.hbm %s944_s5, 2048 }
  0x34   :  { %s56_s15 = sshll.u32 %s835_s14, 4  ;;  %p803_p10 = scmp.ne.s32.totalorder %s944_s5, %s802_s18  ;;  %s57_s15 = int_to_ptr.vmem [resolvable:$true] %s56_s15 }
  0x35   :  { %p806_p11 = scmp.lt.u32.totalorder %s802_s18, %s944_s5 }
  0x37   :  { %p808_p12 = pnand %p806_p11, %p803_p10 }
  0x39   :  { %811 = shalt.err (!%p808_p12)
}
  0x3a   :  { %s812_s1 = scalar_lea.vmem %s57_s15, 2048  ;;  %p817_p0 = scmp.lt.s32.totalorder %s57_s15, %s57_s15 }
  0x3b   :  { %p813_p13 = scmp.ne.s32.totalorder %s57_s15, %s812_s1  ;;  %p818_p1 = scmp.lt.s32.totalorder %s812_s1, %s812_s1 }
  0x3d   :  { %p819_p2 = por %p818_p1, %p817_p0 }
  0x3f   :  { %p820_p3 = pnand %p819_p2, %p813_p13 }
  0x41   :  { %823 = shalt.err (!%p820_p3)
}
  0x42   :  { %s836_s3 = smov 64   ;;  %s837_s23 = smov 4  }
  0x43   :  { %62 = dma.hbm_to_vmem [thread:$0]  %s944_s5, 2048, %s57_s15, [#allocation8], %s836_s3, %s836_s3, %s837_s23  }
  0x44   :  { %824 = dma.done.wait [#allocation3], 32  }
  0x45   :  { %825 = vsyncadd [#allocation3], 4294967264 }
  0x46   :  { %826 = dma.done.wait [#allocation5], 4224  }
  0x47   :  { %827 = vsyncadd [#allocation5], 4294963072 }
  0x48   :  { %828 = dma.done.wait [#allocation8], 2048  }
  0x49   :  { %829 = vsyncadd [#allocation8], 4294965248  ;;  %v838_v0 = vmov 0   ;;  %v80_v1 = vld [vmem:[#allocation4] sm:$0xff]  ;;  %vm102_vm0 = vcmask 1043456   ;;  %vm98_vm1 = vcmask 64512   ;;  %v83_v51 = vlaneseq }
  0x4a   :  { %141 = vmatprep.mubr.bf16.mxu0 %v838_v0  ;;  %v78_v2 = vld [vmem:[#allocation2] sm:$0x3]  ;;  %v587_v3 = vcombine.high %v80_v1, %v80_v1  ;;  %v586_v4 = vcombine.low %v80_v1, %v80_v1  ;;  %v672_v5 = vld [vmem:[#allocation6 + $0x4] ss:$8 sps:$4 sm:$0xff]   ;;  %v674_v6 = vld [vmem:[#allocation6] ss:$8 sps:$4 sm:$0xff]  }
  0x4b   :  { %v675_v7 = vld [vmem:[#allocation6 + $0x14] ss:$8 sps:$4 sm:$0xff]   ;;  %v79_v9 = vpack.c.bf16 %v78_v2, %v78_v2  ;;  %358 = vmatprep.subr.bf16.mxu1 %v672_v5  ;;  %v677_v10 = vld [vmem:[#allocation6 + $0x10] ss:$8 sps:$4 sm:$0xff]   ;;  %v678_v11 = vld [vmem:[#allocation6 + $0x24] ss:$8 sps:$4 sm:$0xff]  }
  0x4c   :  { %588 = vmatprep.subr.msk.bf16.mxu0 %vm102_vm0, %v587_v3  ;;  %v104_v8 = vsel %vm102_vm0, %v586_v4, 0  ;;  %359 = vmatpush1.bf16.msra.mxu1 %v674_v6  ;;  %v680_v12 = vld [vmem:[#allocation6 + $0x20] ss:$8 sps:$4 sm:$0xff]   ;;  %v681_v13 = vld [vmem:[#allocation6 + $0x34] ss:$8 sps:$4 sm:$0xff]   ;;  %v84_v52 = vshrl.u32 %v83_v51, 7 }
  0x4d   :  { %110 = vmatpush1.bf16.msra.mxu0 %v104_v8  ;;  %360 = vmatprep.subr.bf16.mxu1 %v675_v7  ;;  %v683_v14 = vld [vmem:[#allocation6 + $0x30] ss:$8 sps:$4 sm:$0xff]   ;;  %v684_v15 = vld [vmem:[#allocation6 + $0x44] ss:$8 sps:$4 sm:$0xff]   ;;  %v686_v16 = vld [vmem:[#allocation6 + $0x40] ss:$8 sps:$4 sm:$0xff]  }
  0x4e   :  { %v687_v17 = vld [vmem:[#allocation6 + $0x54] ss:$8 sps:$4 sm:$0xff]   ;;  %v689_v18 = vld [vmem:[#allocation6 + $0x50] ss:$8 sps:$4 sm:$0xff]   ;;  %v690_v19 = vld [vmem:[#allocation6 + $0x64] ss:$8 sps:$4 sm:$0xff]  }
  0x4f   :  { %v692_v20 = vld [vmem:[#allocation6 + $0x60] ss:$8 sps:$4 sm:$0xff]   ;;  %v693_v21 = vld [vmem:[#allocation6 + $0x74] ss:$8 sps:$4 sm:$0xff]   ;;  %v695_v22 = vld [vmem:[#allocation6 + $0x70] ss:$8 sps:$4 sm:$0xff]  }
  0x50   :  { %589 = vmatmul.mubr.msk.bf16.vlgmr.msra.gmra.mrb[0].mxu0 %vm98_vm1, %v79_v9  ;;  %361 = vmatpush1.bf16.msra.mxu1 %v677_v10  ;;  %v696_v23 = vld [vmem:[#allocation6 + $0x84] ss:$8 sps:$4 sm:$0xff]   ;;  %v698_v24 = vld [vmem:[#allocation6 + $0x80] ss:$8 sps:$4 sm:$0xff]   ;;  %v699_v25 = vld [vmem:[#allocation6 + $0x94] ss:$8 sps:$4 sm:$0xff]  }
  0x51   :  { %362 = vmatprep.subr.bf16.mxu1 %v678_v11  ;;  %v701_v26 = vld [vmem:[#allocation6 + $0x90] ss:$8 sps:$4 sm:$0xff]   ;;  %v702_v27 = vld [vmem:[#allocation6 + $0xa4] ss:$8 sps:$4 sm:$0xff]   ;;  %v704_v28 = vld [vmem:[#allocation6 + $0xa0] ss:$8 sps:$4 sm:$0xff]  }
  0x52   :  { %v705_v29 = vld [vmem:[#allocation6 + $0xb4] ss:$8 sps:$4 sm:$0xff]   ;;  %v707_v30 = vld [vmem:[#allocation6 + $0xb0] ss:$8 sps:$4 sm:$0xff]   ;;  %v708_v31 = vld [vmem:[#allocation6 + $0xc4] ss:$8 sps:$4 sm:$0xff]  }
  0x53   :  { %v710_v32 = vld [vmem:[#allocation6 + $0xc0] ss:$8 sps:$4 sm:$0xff]   ;;  %v711_v33 = vld [vmem:[#allocation6 + $0xd4] ss:$8 sps:$4 sm:$0xff]   ;;  %v713_v34 = vld [vmem:[#allocation6 + $0xd0] ss:$8 sps:$4 sm:$0xff]  }
  0x54   :  { %363 = vmatpush1.bf16.msra.mxu1 %v680_v12  ;;  %v714_v35 = vld [vmem:[#allocation6 + $0xe4] ss:$8 sps:$4 sm:$0xff]   ;;  %v716_v36 = vld [vmem:[#allocation6 + $0xe0] ss:$8 sps:$4 sm:$0xff]   ;;  %v717_v37 = vld [vmem:[#allocation6 + $0xf4] ss:$8 sps:$4 sm:$0xff]  }
  0x55   :  { %364 = vmatprep.subr.bf16.mxu1 %v681_v13  ;;  %v719_v38 = vld [vmem:[#allocation6 + $0xf0] ss:$8 sps:$4 sm:$0xff]   ;;  %v720_v39 = vld [vmem:[#allocation7 + $0x40] sm:$0xff]   ;;  %v722_v41 = vld [vmem:[#allocation7 + $0x48] sm:$0xff]   ;;  %v85_v53 = vsub.s32 0, %v84_v52  ;;  %v89_v55 = vsub.s32 1, %v84_v52 }
  0x56   :  { %v721_v40 = vld [vmem:[#allocation7] sm:$0xff]   ;;  %639 = vmatprep.subr.bf16.mxu0 %v720_v39  ;;  %v723_v42 = vld [vmem:[#allocation7 + $0x8] sm:$0xff]   ;;  %v724_v43 = vld [vmem:[#allocation7 + $0x50] sm:$0xff]  }
  0x57   :  { %640 = vmatpush3.bf16.msra.mxu0 %v721_v40  ;;  %v725_v44 = vld [vmem:[#allocation7 + $0x10] sm:$0xff]   ;;  %v726_v45 = vld [vmem:[#allocation7 + $0x58] sm:$0xff]   ;;  %v728_v47 = vld [vmem:[#allocation7 + $0x60] sm:$0xff]  }
  0x58   :  { %365 = vmatpush1.bf16.msra.mxu1 %v683_v14  ;;  %641 = vmatprep.subr.bf16.mxu0 %v722_v41  ;;  %v727_v46 = vld [vmem:[#allocation7 + $0x18] sm:$0xff]   ;;  %v729_v48 = vld [vmem:[#allocation7 + $0x20] sm:$0xff]   ;;  %v730_v49 = vld [vmem:[#allocation7 + $0x68] sm:$0xff]  }
  0x59   :  { %366 = vmatprep.subr.bf16.mxu1 %v684_v15  ;;  %v731_v50 = vld [vmem:[#allocation7 + $0x28] sm:$0xff]   ;;  %v732_v4 = vld [vmem:[#allocation7 + $0x70] sm:$0xff]   ;;  %v734_v6 = vld [vmem:[#allocation7 + $0x78] sm:$0xff]  }
  0x5a   :  { %v81_v54 = vld [vmem:[%s941_s2] sm:$0x3]  ;;  %v733_v5 = vld [vmem:[#allocation7 + $0x30] sm:$0xff]   ;;  %v735_v7 = vld [vmem:[#allocation7 + $0x38] sm:$0xff]  }
  0x5b   :  { %642 = vmatpush3.bf16.msra.mxu0 %v723_v42  ;;  %v86_v56 = vrot.slane %v81_v54, %v85_v53  ;;  %v90_v57 = vrot.slane %v81_v54, %v89_v55  ;;  %v186_v8 = vld [vmem:[%s943_s4] sm:$0x3] }
  0x5c   :  { %367 = vmatpush1.bf16.msra.mxu1 %v686_v16  ;;  %643 = vmatprep.subr.bf16.mxu0 %v724_v43  ;;  %v191_v9 = vrot.slane %v186_v8, %v85_v53  ;;  %v195_v10 = vrot.slane %v186_v8, %v89_v55 }
  0x5d   :  { %368 = vmatprep.subr.bf16.mxu1 %v687_v17 }
  0x5f   :  { %644 = vmatpush3.bf16.msra.mxu0 %v725_v44 }
  0x60   :  { %369 = vmatpush1.bf16.msra.mxu1 %v689_v18  ;;  %645 = vmatprep.subr.bf16.mxu0 %v726_v45 }
  0x61   :  { %370 = vmatprep.subr.bf16.mxu1 %v690_v19 }
  0x63   :  { %646 = vmatpush3.bf16.msra.mxu0 %v727_v46 }
  0x64   :  { %371 = vmatpush1.bf16.msra.mxu1 %v692_v20  ;;  %647 = vmatprep.subr.bf16.mxu0 %v728_v47 }
  0x65   :  { %372 = vmatprep.subr.bf16.mxu1 %v693_v21 }
  0x67   :  { %648 = vmatpush3.bf16.msra.mxu0 %v729_v48 }
  0x68   :  { %373 = vmatpush1.bf16.msra.mxu1 %v695_v22  ;;  %649 = vmatprep.subr.bf16.mxu0 %v730_v49  ;;  %v622_v22 = vld [vmem:[%s945_s6] ss:$0 sm:$0xff] }
  0x69   :  { %374 = vmatprep.subr.bf16.mxu1 %v696_v23 }
  0x6b   :  { %650 = vmatpush3.bf16.msra.mxu0 %v731_v50 }
  0x6c   :  { %375 = vmatpush1.bf16.msra.mxu1 %v698_v24  ;;  %651 = vmatprep.subr.bf16.mxu0 %v732_v4 }
  0x6d   :  { %376 = vmatprep.subr.bf16.mxu1 %v699_v25 }
  0x6f   :  { %652 = vmatpush3.bf16.msra.mxu0 %v733_v5 }
  0x70   :  { %377 = vmatpush1.bf16.msra.mxu1 %v701_v26  ;;  %653 = vmatprep.subr.bf16.mxu0 %v734_v6 }
  0x71   :  { %378 = vmatprep.subr.bf16.mxu1 %v702_v27 }
  0x73   :  { %654 = vmatpush3.bf16.msra.mxu0 %v735_v7 }
  0x74   :  { %379 = vmatpush1.bf16.msra.mxu1 %v704_v28 }
  0x75   :  { %380 = vmatprep.subr.bf16.mxu1 %v705_v29 }
  0x78   :  { %381 = vmatpush1.bf16.msra.mxu1 %v707_v30 }
  0x79   :  { %382 = vmatprep.subr.bf16.mxu1 %v708_v31 }
  0x7c   :  { %383 = vmatpush1.bf16.msra.mxu1 %v710_v32 }
  0x7d   :  { %384 = vmatprep.subr.bf16.mxu1 %v711_v33 }
  0x80   :  { %385 = vmatpush1.bf16.msra.mxu1 %v713_v34 }
  0x81   :  { %386 = vmatprep.subr.bf16.mxu1 %v714_v35 }
  0x84   :  { %387 = vmatpush1.bf16.msra.mxu1 %v716_v36 }
  0x85   :  { %388 = vmatprep.subr.bf16.mxu1 %v717_v37 }
  0x88   :  { %389 = vmatpush1.bf16.msra.mxu1 %v719_v38 }
 0x123   :  { %v143_v58 = vpop.f32.mrb[0].mxu0 }
 0x124   :  { %v144_v59 = vadd.f32 %v143_v58, %v86_v56  ;;  %v145_v60 = vpop.f32.mrb[1].mxu0 }
 0x125   :  { %v146_v61 = vadd.f32 %v145_v60, %v90_v57  ;;  %v147_v62 = vpop.f32.mrb[2].mxu0 }
 0x126   :  { %v150_v63 = vmax.f32 %v144_v59, 0.0  ;;  %v148_v0 = vpop.f32.mrb[3].mxu0 }
 0x127   :  { %v151_v1 = vmax.f32 %v146_v61, 0.0 }
 0x128   :  { %v152_v3 = vpack.c.bf16 %v150_v63, %v150_v63 }
 0x129   :  { %v153_v2 = vpack.c.bf16 %v151_v1, %v151_v1 }
 0x12b   :  { %390 = vmatprep.mubr.bf16.mxu1 %v153_v2 }
 0x12c   :  { %391 = vmatmul.mubr.bf16.vlgmr.msra.gmra.mrb[0].mxu1 %v152_v3 }
 0x1ff   :  { %v392_v11 = vpop.f32.mrb[0].mxu1 }
 0x200   :  { %v393_v12 = vadd.f32 %v392_v11, %v191_v9  ;;  %v394_v13 = vpop.f32.mrb[1].mxu1 }
 0x201   :  { %v395_v14 = vadd.f32 %v394_v13, %v195_v10  ;;  %v396_v15 = vpop.f32.mrb[2].mxu1 }
 0x202   :  { %v399_v16 = vmax.f32 %v393_v12, 0.0  ;;  %v397_v17 = vpop.f32.mrb[3].mxu1 }
 0x203   :  { %v400_v18 = vmax.f32 %v395_v14, 0.0 }
 0x204   :  { %v401_v20 = vpack.c.bf16 %v399_v16, %v399_v16 }
 0x205   :  { %v402_v19 = vpack.c.bf16 %v400_v18, %v400_v18 }
 0x207   :  { %570 = vmatprep.mubr.bf16.mxu0 %v402_v19 }
 0x208   :  { %571 = vmatmul.mubr.bf16.vlgmr.msra.gmra.mrb[4].mxu0 %v401_v20 }
 0x2db   :  { %v655_v21 = vpop.f32.mrb[4].mxu0 }
 0x2dc   :  { %v656_v23 = vpop.f32.mrb[5].mxu0 }
 0x2dd   :  { %v657_v24 = vadd.f32 %v656_v23, %v655_v21  ;;  %v658_v25 = vpop.f32.mrb[6].mxu0 }
 0x2de   :  { %v659_v26 = vpop.f32.mrb[7].mxu0 }
 0x2df   :  { %v573_v27 = vadd.f32 %v657_v24, %v622_v22 }
 0x2e1   :  { %578 = vst [vmem:[%s946_s7] sm:$0x3] %v573_v27 }
 0x2e2   :  { %583 = vsyncpa [#allocation3], 1 }
 0x2e3   :  { %584 = vsyncpa [#allocation5], 1 }
 0x2e4   :  { %585 = vsyncpa [#allocation8], 1 }

</bundles_post_ra>
